<compile_context>
chip_gen: v6e
topology: v6e:2x2x1
jax: 0.10.0
libtpu: 0.0.40
codegen_flags: <defaults>
</compile_context>

<pallas_src>
import functools

import jax
import jax.numpy as jnp
from jax import lax
from jax.experimental import pallas as pl
from jax.experimental.pallas import tpu as pltpu


def _patch_merging_kernel(x_ref, g_ref, b_ref, w_ref, o_ref, *, eps):
    # x_ref: (tm, 4C)   merged-patch tokens
    # g_ref: (1, 4C)    LayerNorm weight (gamma)
    # b_ref: (1, 4C)    LayerNorm bias   (beta)
    # w_ref: (4C, 2C)   reduction weight, pre-transposed (in, out), no bias
    # o_ref: (tm, 2C)
    x = x_ref[...].astype(jnp.float32)

    # LayerNorm over the last (4C) dim, f32 math.
    mean = jnp.mean(x, axis=-1, keepdims=True)
    xc = x - mean
    var = jnp.mean(xc * xc, axis=-1, keepdims=True)
    xn = xc * lax.rsqrt(var + eps)
    xn = xn * g_ref[...].astype(jnp.float32) + b_ref[...].astype(jnp.float32)

    # Linear(4C -> 2C), no bias.  MXU operands in the weight dtype, f32 acc.
    y = jnp.dot(xn.astype(w_ref.dtype), w_ref[...],
                preferred_element_type=jnp.float32)
    o_ref[...] = y.astype(o_ref.dtype)


@functools.partial(jax.jit, static_argnames=("tm", "eps"))
def patch_merging_pallas(x, gamma, beta, w_red, *, tm=256, eps=1e-5):
    """PatchMerging forward.

    x:      (B, n_contrast, H, W, C)
    gamma:  (4C,)   LayerNorm weight
    beta:   (4C,)   LayerNorm bias
    w_red:  (4C, 2C) reduction weight, transposed from torch's (2C, 4C) layout
    returns (B, n_contrast, H//2, W//2, 2C)
    """
    B, n, H, W, C = x.shape
    assert H % 2 == 0 and W % 2 == 0, f"x size ({H}*{W}) are not even."
    assert tm % 8 == 0, "tm must be a multiple of 8 sublanes"
    C4 = 4 * C
    C2 = w_red.shape[1]

    # --- 2x2 spatial merge (layout plumbing, outside the kernel). ---
    # torch concat order [x0, x1, x2, x3] == last dim laid out as
    # (w_parity major, h_parity minor, C), so transpose accordingly.
    xm = x.reshape(B, n, H // 2, 2, W // 2, 2, C)          # (B,n,H2,hp,W2,wp,C)
    xm = jnp.transpose(xm, (0, 1, 2, 4, 5, 3, 6))          # (B,n,H2,W2,wp,hp,C)
    x2d = xm.reshape(-1, C4)                               # (n_tok, 4C)

    n_tok = x2d.shape[0]
    n_pad = pl.cdiv(n_tok, tm) * tm
    if n_pad != n_tok:
        # Zero-pad the token axis; padded rows are sliced off afterwards
        # (LayerNorm of a zero row is finite thanks to eps, so no NaNs).
        x2d = jnp.pad(x2d, ((0, n_pad - n_tok), (0, 0)))

    g2d = gamma.reshape(1, C4)
    b2d = beta.reshape(1, C4)

    grid = (n_pad // tm,)

    # Advisory cost estimate for the XLA scheduler.
    itemsize = x.dtype.itemsize
    flops = 2 * n_pad * C4 * C2 + 8 * n_pad * C4
    bytes_accessed = (n_pad * C4 * itemsize            # x slab
                      + C4 * C2 * w_red.dtype.itemsize  # weight
                      + 2 * C4 * gamma.dtype.itemsize   # gamma/beta
                      + n_pad * C2 * itemsize)          # output
    cost = pl.CostEstimate(flops=flops, transcendentals=n_pad,
                           bytes_accessed=bytes_accessed)

    # Explicit VMEM budget: double-buffered x/out tiles + resident weights +
    # f32 LN intermediates, with 2x headroom, clamped to a safe range.
    vmem_needed = (2 * tm * (C4 + C2) * itemsize
                   + 2 * C4 * C2 * w_red.dtype.itemsize
                   + 4 * C4 * 4
                   + 4 * tm * C4)
    vmem_limit = int(min(max(2 * vmem_needed, 32 * 1024 * 1024),
                         96 * 1024 * 1024))

    out2d = pl.pallas_call(
        functools.partial(_patch_merging_kernel, eps=eps),
        out_shape=jax.ShapeDtypeStruct((n_pad, C2), x.dtype),
        grid_spec=pltpu.PrefetchScalarGridSpec(
            num_scalar_prefetch=0,
            grid=grid,
            in_specs=[
                pl.BlockSpec((tm, C4), lambda i: (i, 0)),   # tokens (pipelined)
                pl.BlockSpec((1, C4), lambda i: (0, 0)),    # gamma (resident)
                pl.BlockSpec((1, C4), lambda i: (0, 0)),    # beta  (resident)
                pl.BlockSpec((C4, C2), lambda i: (0, 0)),   # weight (resident)
            ],
            out_specs=pl.BlockSpec((tm, C2), lambda i: (i, 0)),
        ),
        compiler_params=pltpu.CompilerParams(
            dimension_semantics=("parallel",),
            vmem_limit_bytes=vmem_limit,
        ),
        cost_estimate=cost,
    )(x2d, g2d, b2d, w_red)

    out2d = out2d[:n_tok]
    return out2d.reshape(B, n, H // 2, W // 2, C2)


def _reference_patch_merging(x, gamma, beta, w_red, eps=1e-5):
    # Pure-JAX reference mirroring the PyTorch forward.
    x0 = x[:, :, 0::2, 0::2, :]
    x1 = x[:, :, 1::2, 0::2, :]
    x2 = x[:, :, 0::2, 1::2, :]
    x3 = x[:, :, 1::2, 1::2, :]
    xm = jnp.concatenate([x0, x1, x2, x3], axis=-1)        # (B,n,H/2,W/2,4C)
    mean = jnp.mean(xm, axis=-1, keepdims=True)
    var = jnp.var(xm, axis=-1, keepdims=True)
    xn = (xm - mean) / jnp.sqrt(var + eps) * gamma + beta
    return jnp.dot(xn, w_red)


if __name__ == "__main__":
    # Small shapes consistent with the module: x of shape (B, n_contrast, H, W, C).
    B, n_contrast, H, W, C = 2, 3, 16, 16, 32   # 4C = 128 (lane-dense LN dim)

    key = jax.random.PRNGKey(0)
    kx, kg, kb, kw = jax.random.split(key, 4)

    x = jax.random.normal(kx, (B, n_contrast, H, W, C), dtype=jnp.float32)
    gamma = 1.0 + 0.1 * jax.random.normal(kg, (4 * C,), dtype=jnp.float32)
    beta = 0.1 * jax.random.normal(kb, (4 * C,), dtype=jnp.float32)
    # torch nn.Linear(4C, 2C, bias=False) stores weight as (2C, 4C); pre-transpose.
    w_red = 0.05 * jax.random.normal(kw, (4 * C, 2 * C), dtype=jnp.float32)

    out = patch_merging_pallas(x, gamma, beta, w_red, tm=256)
    out = jax.block_until_ready(out)

    ref = _reference_patch_merging(x, gamma, beta, w_red)
    assert out.shape == (B, n_contrast, H // 2, W // 2, 2 * C)
    max_err = float(jnp.max(jnp.abs(out - ref)))
    assert jnp.allclose(out, ref, atol=1e-3, rtol=1e-3), \
        f"mismatch vs reference (max abs err {max_err})"

    print("KERNEL_OK")
</pallas_src>

<mosaic_0001>
module attributes {stable_mosaic.version = 11 : i64} {
  func.func @_patch_merging_kernel(%arg0: i32, %arg1: memref<256x128xf32, #tpu.memory_space<vmem>>, %arg2: memref<1x128xf32, #tpu.memory_space<vmem>>, %arg3: memref<1x128xf32, #tpu.memory_space<vmem>>, %arg4: memref<128x64xf32, #tpu.memory_space<vmem>>, %arg5: memref<256x64xf32, #tpu.memory_space<vmem>>) attributes {dimension_semantics = [#tpu.dimension_semantics<parallel>], iteration_bounds = array<i64: 2>, scalar_prefetch = 0 : i64, scratch_operands = 0 : i64, tpu.core_type = #tpu.core_type<tc>, window_params = [{transform_indices = @transform_0, window_bounds = array<i64: 256, 128>}, {pipeline_mode = #tpu.pipeline_mode<synchronous>, transform_indices = @transform_1, window_bounds = array<i64: 1, 128>}, {pipeline_mode = #tpu.pipeline_mode<synchronous>, transform_indices = @transform_2, window_bounds = array<i64: 1, 128>}, {pipeline_mode = #tpu.pipeline_mode<synchronous>, transform_indices = @transform_3, window_bounds = array<i64: 128, 64>}, {transform_indices = @transform_4, window_bounds = array<i64: 256, 64>}]} {
    %c0 = arith.constant 0 : index
    %c0_0 = arith.constant 0 : index
    %0 = vector.load %arg1[%c0, %c0_0] : memref<256x128xf32, #tpu.memory_space<vmem>>, vector<256x128xf32>
    %cst = arith.constant dense<0.000000e+00> : vector<256xf32>
    %1 = vector.multi_reduction <add>, %0, %cst [1] : vector<256x128xf32> to vector<256xf32>
    %2 = vector.shape_cast %1 : vector<256xf32> to vector<256x1xf32>
    %cst_1 = arith.constant 1.280000e+02 : f32
    %3 = vector.broadcast %cst_1 : f32 to vector<256x1xf32>
    %4 = arith.divf %2, %3 : vector<256x1xf32>
    %5 = vector.broadcast %4 : vector<256x1xf32> to vector<256x128xf32>
    %6 = arith.subf %0, %5 : vector<256x128xf32>
    %7 = arith.mulf %6, %6 : vector<256x128xf32>
    %cst_2 = arith.constant dense<0.000000e+00> : vector<256xf32>
    %8 = vector.multi_reduction <add>, %7, %cst_2 [1] : vector<256x128xf32> to vector<256xf32>
    %9 = vector.shape_cast %8 : vector<256xf32> to vector<256x1xf32>
    %cst_3 = arith.constant 1.280000e+02 : f32
    %10 = vector.broadcast %cst_3 : f32 to vector<256x1xf32>
    %11 = arith.divf %9, %10 : vector<256x1xf32>
    %cst_4 = arith.constant 9.99999974E-6 : f32
    %12 = vector.broadcast %cst_4 : f32 to vector<256x1xf32>
    %13 = arith.addf %11, %12 : vector<256x1xf32>
    %14 = math.rsqrt %13 : vector<256x1xf32>
    %15 = vector.broadcast %14 : vector<256x1xf32> to vector<256x128xf32>
    %16 = arith.mulf %6, %15 : vector<256x128xf32>
    %c0_5 = arith.constant 0 : index
    %c0_6 = arith.constant 0 : index
    %17 = vector.load %arg2[%c0_5, %c0_6] : memref<1x128xf32, #tpu.memory_space<vmem>>, vector<1x128xf32>
    %18 = vector.broadcast %17 : vector<1x128xf32> to vector<256x128xf32>
    %19 = arith.mulf %16, %18 : vector<256x128xf32>
    %c0_7 = arith.constant 0 : index
    %c0_8 = arith.constant 0 : index
    %20 = vector.load %arg3[%c0_7, %c0_8] : memref<1x128xf32, #tpu.memory_space<vmem>>, vector<1x128xf32>
    %21 = vector.broadcast %20 : vector<1x128xf32> to vector<256x128xf32>
    %22 = arith.addf %19, %21 : vector<256x128xf32>
    %c0_9 = arith.constant 0 : index
    %c0_10 = arith.constant 0 : index
    %23 = vector.load %arg4[%c0_9, %c0_10] : memref<128x64xf32, #tpu.memory_space<vmem>>, vector<128x64xf32>
    %cst_11 = arith.constant dense<0.000000e+00> : vector<256x64xf32>
    %24 = tpu.matmul %22, %23, %cst_11 {dimension_numbers = #tpu.dot_dimension_numbers<[1], [0], [0], [1], [0, 0, 1, 1], [], []>} : vector<256x128xf32>, vector<128x64xf32>, vector<256x64xf32> -> vector<256x64xf32>
    %c0_12 = arith.constant 0 : index
    %c0_13 = arith.constant 0 : index
    %25 = vector.load %arg5[%c0_12, %c0_13] : memref<256x64xf32, #tpu.memory_space<vmem>>, vector<256x64xf32>
    tpu.vector_store %arg5[%c0_12, %c0_13], %24 {strides = array<i32>} : memref<256x64xf32, #tpu.memory_space<vmem>>, vector<256x64xf32>,
    return
  }
  func.func @transform_0(%arg0: i32) -> (i32, i32) {
    %c0_i32 = arith.constant 0 : i32
    %c0_i32_0 = arith.constant 0 : i32
    return %arg0, %c0_i32 : i32, i32
  }
  func.func @transform_1(%arg0: i32) -> (i32, i32) {
    %c0_i32 = arith.constant 0 : i32
    %c0_i32_0 = arith.constant 0 : i32
    %c0_i32_1 = arith.constant 0 : i32
    return %c0_i32, %c0_i32_0 : i32, i32
  }
  func.func @transform_2(%arg0: i32) -> (i32, i32) {
    %c0_i32 = arith.constant 0 : i32
    %c0_i32_0 = arith.constant 0 : i32
    %c0_i32_1 = arith.constant 0 : i32
    return %c0_i32, %c0_i32_0 : i32, i32
  }
  func.func @transform_3(%arg0: i32) -> (i32, i32) {
    %c0_i32 = arith.constant 0 : i32
    %c0_i32_0 = arith.constant 0 : i32
    %c0_i32_1 = arith.constant 0 : i32
    return %c0_i32, %c0_i32_0 : i32, i32
  }
  func.func @transform_4(%arg0: i32) -> (i32, i32) {
    %c0_i32 = arith.constant 0 : i32
    %c0_i32_0 = arith.constant 0 : i32
    return %arg0, %c0_i32 : i32, i32
  }
}

</mosaic_0001>

<bundles_post_ra>
// kernel: patch_merging_pallas.1
= control target key start
LH: loop header
LB: loop body
LE: loop exit
PB: predicated region body
PF: predicated region fallthrough
CT: control target
= control target key end

     0   :  { %s1272_s15 = smov 0   ;;  %s1806_s0 = inlined_call_operand.vmem [shape: f32[512,128], index: 0, kind: input, shape index: {}]   ;;  %s1807_s1 = inlined_call_operand.vmem [shape: f32[1,128], index: 1, kind: input, shape index: {}]   ;;  %s1808_s2 = inlined_call_operand.vmem [shape: f32[1,128], index: 2, kind: input, shape index: {}]   ;;  %s1809_s3 = inlined_call_operand.vmem [shape: f32[128,64], index: 3, kind: input, shape index: {}]   ;;  %s1810_s4 = inlined_call_operand.vmem [shape: f32[512,64], index: 4, kind: output, shape index: {}]  }
   0x1 LB: > { %s994_s16 = sadd.s32 4294967295, %s1245_s15   ;;  %p998_p0 = scmp.ge.s32.totalorder %s1245_s15, 1  ;;  %s1245_s15 = sphi %s1272_s15, %s14_s15  }
   0x2   : > { %p163_p1 = scmp.lt.s32.totalorder %s1245_s15, 3 }
   0x4   : > { %p164_p2 = pnand %p998_p0, %p163_p1 }
   0x5   : > { %s999_s17 = sshll.u32 (!%p164_p2), %s994_s16, 5 }
   0x6   : > { %167 = sbr.rel (%p164_p2) target bundleno = 581 (0x245), region = 36  ;;  %p190_p3 = scmp.lt.s32.totalorder (!%p164_p2), %s999_s17, 63 }
   0xb   : > { %s1812_s17 = smov (!%p190_p3, %s999_s17), 63  ;;  %v679_v32 = vld [vmem:[%s1809_s3 + $0x78] sm:$0xff]  ;;  %v678_v33 = vld [vmem:[%s1809_s3 + $0x70] sm:$0xff]  ;;  %vm905_vm0 = vcmask 523264  }
   0xc   : > { %s1000_s18 = sshll.u32 %s1812_s17, 3  ;;  %1055 = vmatprep.subr.mxu0 %v679_v32  ;;  %1135 = vmatprep.subr.mxu1 %v679_v32 }
   0xd   : > { %s1288_s21 = scalar_lea.vmem %s1806_s0, %s1000_s18  ;;  %1056 = vmatpush3.msra.mxu0 %v679_v32  ;;  %1151 = vmatpush3.msra.mxu1 %v679_v32  ;;  %s1737_s11 = scalar_lea.vmem %s1810_s4, %s1000_s18 }
   0xe   : > { %v1291_v0 = vld [vmem:[%s1288_s21] sm:$0xff]  ;;  %v1294_v1 = vld [vmem:[%s1288_s21 + $0x8] sm:$0xff]  ;;  %v1307_v4 = vld [vmem:[%s1288_s21 + $0x10] sm:$0xff]  ;;  %1057 = vmatprep.subr.mxu0 %v678_v33  ;;  %1136 = vmatprep.subr.mxu1 %v678_v33 }
   0xf   : > { %233 = vadd.xlane.f32.xlu0 %v1291_v0  ;;  %235 = vadd.xlane.f32.xlu1 %v1294_v1  ;;  %v1299_v2 = vld [vmem:[%s1288_s21 + $0x80] sm:$0xff]  ;;  %v1302_v3 = vld [vmem:[%s1288_s21 + $0x88] sm:$0xff]  ;;  %v1310_v5 = vld [vmem:[%s1288_s21 + $0x90] sm:$0xff] }
  0x10   : > { %v1315_v6 = vld [vmem:[%s1288_s21 + $0x18] sm:$0xff]  ;;  %v1323_v8 = vld [vmem:[%s1288_s21 + $0x20] sm:$0xff]  ;;  %v1331_v10 = vld [vmem:[%s1288_s21 + $0x28] sm:$0xff]  ;;  %1058 = vmatpush3.msra.mxu0 %v678_v33  ;;  %1152 = vmatpush3.msra.mxu1 %v678_v33 }
  0x11   : > { %v1318_v7 = vld [vmem:[%s1288_s21 + $0x98] sm:$0xff]  ;;  %v1326_v9 = vld [vmem:[%s1288_s21 + $0xa0] sm:$0xff]  ;;  %v1334_v11 = vld [vmem:[%s1288_s21 + $0xa8] sm:$0xff] }
  0x12   : > { %v1339_v12 = vld [vmem:[%s1288_s21 + $0x30] sm:$0xff]  ;;  %v1347_v14 = vld [vmem:[%s1288_s21 + $0x38] sm:$0xff]  ;;  %v1355_v16 = vld [vmem:[%s1288_s21 + $0x40] sm:$0xff] }
  0x13   : > { %265 = vadd.xlane.f32.xlu0 %v1299_v2  ;;  %267 = vadd.xlane.f32.xlu1 %v1302_v3  ;;  %v1342_v13 = vld [vmem:[%s1288_s21 + $0xb0] sm:$0xff]  ;;  %v1350_v15 = vld [vmem:[%s1288_s21 + $0xb8] sm:$0xff]  ;;  %v1358_v17 = vld [vmem:[%s1288_s21 + $0xc0] sm:$0xff] }
  0x14   : > { %v1363_v18 = vld [vmem:[%s1288_s21 + $0x48] sm:$0xff]  ;;  %v1371_v20 = vld [vmem:[%s1288_s21 + $0x50] sm:$0xff]  ;;  %v1379_v22 = vld [vmem:[%s1288_s21 + $0x58] sm:$0xff] }
  0x15   : > { %v1366_v19 = vld [vmem:[%s1288_s21 + $0xc8] sm:$0xff]  ;;  %v1374_v21 = vld [vmem:[%s1288_s21 + $0xd0] sm:$0xff]  ;;  %v1382_v23 = vld [vmem:[%s1288_s21 + $0xd8] sm:$0xff] }
  0x16   : > { %v1387_v24 = vld [vmem:[%s1288_s21 + $0x60] sm:$0xff]  ;;  %v1395_v26 = vld [vmem:[%s1288_s21 + $0x68] sm:$0xff]  ;;  %v1403_v28 = vld [vmem:[%s1288_s21 + $0x70] sm:$0xff] }
  0x17   : > { %237 = vadd.xlane.f32.xlu0 %v1307_v4  ;;  %269 = vadd.xlane.f32.xlu1 %v1310_v5  ;;  %v1390_v25 = vld [vmem:[%s1288_s21 + $0xe0] sm:$0xff]  ;;  %v1398_v27 = vld [vmem:[%s1288_s21 + $0xe8] sm:$0xff]  ;;  %v1406_v29 = vld [vmem:[%s1288_s21 + $0xf0] sm:$0xff] }
  0x18   : > { %v1411_v30 = vld [vmem:[%s1288_s21 + $0x78] sm:$0xff] }
  0x19   : > { %v1414_v31 = vld [vmem:[%s1288_s21 + $0xf8] sm:$0xff] }
  0x1b   : > { %239 = vadd.xlane.f32.xlu0 %v1315_v6  ;;  %271 = vadd.xlane.f32.xlu1 %v1318_v7 }
  0x1f   : > { %241 = vadd.xlane.f32.xlu0 %v1323_v8  ;;  %273 = vadd.xlane.f32.xlu1 %v1326_v9 }
  0x23   : > { %243 = vadd.xlane.f32.xlu0 %v1331_v10  ;;  %275 = vadd.xlane.f32.xlu1 %v1334_v11 }
  0x27   : > { %245 = vadd.xlane.f32.xlu0 %v1339_v12  ;;  %277 = vadd.xlane.f32.xlu1 %v1342_v13 }
  0x2b   : > { %247 = vadd.xlane.f32.xlu0 %v1347_v14  ;;  %279 = vadd.xlane.f32.xlu1 %v1350_v15 }
  0x2f   : > { %249 = vadd.xlane.f32.xlu0 %v1355_v16  ;;  %281 = vadd.xlane.f32.xlu1 %v1358_v17 }
  0x33   : > { %251 = vadd.xlane.f32.xlu0 %v1363_v18  ;;  %283 = vadd.xlane.f32.xlu1 %v1366_v19 }
  0x37   : > { %253 = vadd.xlane.f32.xlu0 %v1371_v20  ;;  %285 = vadd.xlane.f32.xlu1 %v1374_v21 }
  0x3b   : > { %255 = vadd.xlane.f32.xlu0 %v1379_v22  ;;  %287 = vadd.xlane.f32.xlu1 %v1382_v23 }
  0x3f   : > { %257 = vadd.xlane.f32.xlu0 %v1387_v24  ;;  %289 = vadd.xlane.f32.xlu1 %v1390_v25 }
  0x43   : > { %259 = vadd.xlane.f32.xlu0 %v1395_v26  ;;  %291 = vadd.xlane.f32.xlu1 %v1398_v27 }
  0x47   : > { %261 = vadd.xlane.f32.xlu0 %v1403_v28  ;;  %293 = vadd.xlane.f32.xlu1 %v1406_v29 }
  0x4b   : > { %263 = vadd.xlane.f32.xlu0 %v1411_v30  ;;  %295 = vadd.xlane.f32.xlu1 %v1414_v31 }
  0x98   : > { %v234_v34 = vpop.xlane.xlu0 %233  ;;  %v236_v35 = vpop.xlane.xlu1 %235 }
  0x99   : > { %v298_v36 = vmul.f32 0.0078125, %v234_v34  ;;  %v299_v37 = vmul.f32 0.0078125, %v236_v35 }
  0x9b   : > { %v1425_v38 = vsub.f32 %v1291_v0, %v298_v36  ;;  %v1428_v39 = vsub.f32 %v1294_v1, %v299_v37 }
  0x9c   : > { %v266_v40 = vpop.xlane.xlu0 %265  ;;  %v268_v41 = vpop.xlane.xlu1 %267 }
  0x9d   : > { %v314_v42 = vmul.f32 0.0078125, %v266_v40  ;;  %v362_v43 = vmul.f32 %v1425_v38, %v1425_v38  ;;  %v315_v44 = vmul.f32 0.0078125, %v268_v41  ;;  %v363_v47 = vmul.f32 %v1428_v39, %v1428_v39 }
  0x9f   : > { %v1433_v45 = vsub.f32 %v1299_v2, %v314_v42  ;;  %394 = vadd.xlane.f32.xlu0 %v362_v43  ;;  %v1436_v46 = vsub.f32 %v1302_v3, %v315_v44  ;;  %v677_v2 = vld [vmem:[%s1809_s3 + $0x68] sm:$0xff]  ;;  %v674_v43 = vld [vmem:[%s1809_s3 + $0x50] sm:$0xff] }
  0xa0   : > { %v238_v48 = vpop.xlane.xlu0 %237  ;;  %v270_v49 = vpop.xlane.xlu1 %269  ;;  %1059 = vmatprep.subr.mxu0 %v677_v2  ;;  %1137 = vmatprep.subr.mxu1 %v677_v2 }
  0xa1   : > { %v300_v50 = vmul.f32 0.0078125, %v238_v48  ;;  %v378_v51 = vmul.f32 %v1433_v45, %v1433_v45  ;;  %v316_v52 = vmul.f32 0.0078125, %v270_v49  ;;  %v379_v55 = vmul.f32 %v1436_v46, %v1436_v46  ;;  %1060 = vmatpush3.msra.mxu0 %v677_v2  ;;  %1153 = vmatpush3.msra.mxu1 %v677_v2 }
  0xa3   : > { %v1443_v53 = vsub.f32 %v1307_v4, %v300_v50  ;;  %396 = vadd.xlane.f32.xlu0 %v363_v47  ;;  %426 = vadd.xlane.f32.xlu1 %v378_v51  ;;  %v1446_v54 = vsub.f32 %v1310_v5, %v316_v52 }
  0xa4   : > { %v240_v56 = vpop.xlane.xlu0 %239  ;;  %v272_v57 = vpop.xlane.xlu1 %271 }
  0xa5   : > { %v301_v58 = vmul.f32 0.0078125, %v240_v56  ;;  %v364_v59 = vmul.f32 %v1443_v53, %v1443_v53  ;;  %v317_v60 = vmul.f32 0.0078125, %v272_v57  ;;  %v380_v63 = vmul.f32 %v1446_v54, %v1446_v54 }
  0xa7   : > { %v1453_v61 = vsub.f32 %v1315_v6, %v301_v58  ;;  %428 = vadd.xlane.f32.xlu1 %v379_v55  ;;  %398 = vadd.xlane.f32.xlu0 %v364_v59  ;;  %v1456_v62 = vsub.f32 %v1318_v7, %v317_v60  ;;  %v676_v6 = vld [vmem:[%s1809_s3 + $0x60] sm:$0xff] }
  0xa8   : > { %v242_v0 = vpop.xlane.xlu0 %241  ;;  %v274_v1 = vpop.xlane.xlu1 %273  ;;  %1061 = vmatprep.subr.mxu0 %v676_v6  ;;  %1138 = vmatprep.subr.mxu1 %v676_v6  ;;  %v672_v55 = vld [vmem:[%s1809_s3 + $0x40] sm:$0xff] }
  0xa9   : > { %v302_v3 = vmul.f32 0.0078125, %v242_v0  ;;  %v365_v4 = vmul.f32 %v1453_v61, %v1453_v61  ;;  %v318_v5 = vmul.f32 0.0078125, %v274_v1  ;;  %v381_v33 = vmul.f32 %v1456_v62, %v1456_v62  ;;  %1062 = vmatpush3.msra.mxu0 %v676_v6  ;;  %1154 = vmatpush3.msra.mxu1 %v676_v6 }
  0xab   : > { %v1469_v7 = vsub.f32 %v1323_v8, %v302_v3  ;;  %430 = vadd.xlane.f32.xlu1 %v380_v63  ;;  %400 = vadd.xlane.f32.xlu0 %v365_v4  ;;  %v1472_v32 = vsub.f32 %v1326_v9, %v318_v5  ;;  %v675_v8 = vld [vmem:[%s1809_s3 + $0x58] sm:$0xff] }
  0xac   : > { %v244_v34 = vpop.xlane.xlu0 %243  ;;  %v276_v35 = vpop.xlane.xlu1 %275  ;;  %1063 = vmatprep.subr.mxu0 %v675_v8  ;;  %1139 = vmatprep.subr.mxu1 %v675_v8 }
  0xad   : > { %v303_v36 = vmul.f32 0.0078125, %v244_v34  ;;  %v366_v37 = vmul.f32 %v1469_v7, %v1469_v7  ;;  %v319_v40 = vmul.f32 0.0078125, %v276_v35  ;;  %v382_v42 = vmul.f32 %v1472_v32, %v1472_v32  ;;  %1064 = vmatpush3.msra.mxu0 %v675_v8  ;;  %1155 = vmatpush3.msra.mxu1 %v675_v8  ;;  %v669_v34 = vld [vmem:[%s1809_s3 + $0x28] sm:$0xff] }
  0xae   : > { %1065 = vmatprep.subr.mxu0 %v674_v43  ;;  %1140 = vmatprep.subr.mxu1 %v674_v43 }
  0xaf   : > { %v1482_v9 = vsub.f32 %v1331_v10, %v303_v36  ;;  %432 = vadd.xlane.f32.xlu1 %v381_v33  ;;  %402 = vadd.xlane.f32.xlu0 %v366_v37  ;;  %v1485_v41 = vsub.f32 %v1334_v11, %v319_v40  ;;  %v673_v11 = vld [vmem:[%s1809_s3 + $0x48] sm:$0xff] }
  0xb0   : > { %v246_v44 = vpop.xlane.xlu0 %245  ;;  %v278_v47 = vpop.xlane.xlu1 %277  ;;  %1066 = vmatpush3.msra.mxu0 %v674_v43  ;;  %1156 = vmatpush3.msra.mxu1 %v674_v43 }
  0xb1   : > { %v304_v48 = vmul.f32 0.0078125, %v246_v44  ;;  %v367_v10 = vmul.f32 %v1482_v9, %v1482_v9  ;;  %v320_v49 = vmul.f32 0.0078125, %v278_v47  ;;  %v383_v52 = vmul.f32 %v1485_v41, %v1485_v41  ;;  %1067 = vmatprep.subr.mxu0 %v673_v11  ;;  %1141 = vmatprep.subr.mxu1 %v673_v11 }
  0xb2   : > { %1068 = vmatpush3.msra.mxu0 %v673_v11  ;;  %1157 = vmatpush3.msra.mxu1 %v673_v11 }
  0xb3   : > { %v1498_v50 = vsub.f32 %v1339_v12, %v304_v48  ;;  %434 = vadd.xlane.f32.xlu1 %v382_v42  ;;  %404 = vadd.xlane.f32.xlu0 %v367_v10  ;;  %v1501_v51 = vsub.f32 %v1342_v13, %v320_v49  ;;  %v671_v13 = vld [vmem:[%s1809_s3 + $0x38] sm:$0xff] }
  0xb4   : > { %v248_v56 = vpop.xlane.xlu0 %247  ;;  %v280_v57 = vpop.xlane.xlu1 %279  ;;  %1069 = vmatprep.subr.mxu0 %v672_v55  ;;  %1142 = vmatprep.subr.mxu1 %v672_v55 }
  0xb5   : > { %v305_v58 = vmul.f32 0.0078125, %v248_v56  ;;  %v368_v12 = vmul.f32 %v1498_v50, %v1498_v50  ;;  %v321_v59 = vmul.f32 0.0078125, %v280_v57  ;;  %v384_v0 = vmul.f32 %v1501_v51, %v1501_v51  ;;  %1070 = vmatpush3.msra.mxu0 %v672_v55  ;;  %1158 = vmatpush3.msra.mxu1 %v672_v55  ;;  %v666_v55 = vld [vmem:[%s1809_s3 + $0x10] sm:$0xff] }
  0xb6   : > { %1071 = vmatprep.subr.mxu0 %v671_v13  ;;  %1143 = vmatprep.subr.mxu1 %v671_v13 }
  0xb7   : > { %v1514_v60 = vsub.f32 %v1347_v14, %v305_v58  ;;  %436 = vadd.xlane.f32.xlu1 %v383_v52  ;;  %406 = vadd.xlane.f32.xlu0 %v368_v12  ;;  %v1517_v63 = vsub.f32 %v1350_v15, %v321_v59  ;;  %v670_v14 = vld [vmem:[%s1809_s3 + $0x30] sm:$0xff] }
  0xb8   : > { %v250_v1 = vpop.xlane.xlu0 %249  ;;  %v282_v2 = vpop.xlane.xlu1 %281  ;;  %1072 = vmatpush3.msra.mxu0 %v671_v13  ;;  %1159 = vmatpush3.msra.mxu1 %v671_v13 }
  0xb9   : > { %v306_v3 = vmul.f32 0.0078125, %v250_v1  ;;  %v369_v4 = vmul.f32 %v1514_v60, %v1514_v60  ;;  %v322_v5 = vmul.f32 0.0078125, %v282_v2  ;;  %v385_v33 = vmul.f32 %v1517_v63, %v1517_v63  ;;  %1073 = vmatprep.subr.mxu0 %v670_v14  ;;  %1144 = vmatprep.subr.mxu1 %v670_v14 }
  0xba   : > { %1074 = vmatpush3.msra.mxu0 %v670_v14  ;;  %1160 = vmatpush3.msra.mxu1 %v670_v14 }
  0xbb   : > { %v1527_v15 = vsub.f32 %v1355_v16, %v306_v3  ;;  %438 = vadd.xlane.f32.xlu1 %v384_v0  ;;  %408 = vadd.xlane.f32.xlu0 %v369_v4  ;;  %v1530_v6 = vsub.f32 %v1358_v17, %v322_v5  ;;  %v668_v17 = vld [vmem:[%s1809_s3 + $0x20] sm:$0xff] }
  0xbc   : > { %v252_v35 = vpop.xlane.xlu0 %251  ;;  %v284_v36 = vpop.xlane.xlu1 %283  ;;  %1075 = vmatprep.subr.mxu0 %v669_v34  ;;  %1145 = vmatprep.subr.mxu1 %v669_v34 }
  0xbd   : > { %v307_v37 = vmul.f32 0.0078125, %v252_v35  ;;  %v370_v16 = vmul.f32 %v1527_v15, %v1527_v15  ;;  %v323_v40 = vmul.f32 0.0078125, %v284_v36  ;;  %v386_v43 = vmul.f32 %v1530_v6, %v1530_v6  ;;  %1076 = vmatpush3.msra.mxu0 %v669_v34  ;;  %1161 = vmatpush3.msra.mxu1 %v669_v34 }
  0xbe   : > { %1077 = vmatprep.subr.mxu0 %v668_v17  ;;  %1146 = vmatprep.subr.mxu1 %v668_v17 }
  0xbf   : > { %v1543_v8 = vsub.f32 %v1363_v18, %v307_v37  ;;  %440 = vadd.xlane.f32.xlu1 %v385_v33  ;;  %410 = vadd.xlane.f32.xlu0 %v370_v16  ;;  %v1546_v42 = vsub.f32 %v1366_v19, %v323_v40  ;;  %v667_v18 = vld [vmem:[%s1809_s3 + $0x18] sm:$0xff] }
  0xc0   : > { %v254_v44 = vpop.xlane.xlu0 %253  ;;  %v286_v47 = vpop.xlane.xlu1 %285  ;;  %1078 = vmatpush3.msra.mxu0 %v668_v17  ;;  %1162 = vmatpush3.msra.mxu1 %v668_v17 }
  0xc1   : > { %v308_v48 = vmul.f32 0.0078125, %v254_v44  ;;  %v371_v10 = vmul.f32 %v1543_v8, %v1543_v8  ;;  %v324_v49 = vmul.f32 0.0078125, %v286_v47  ;;  %v387_v52 = vmul.f32 %v1546_v42, %v1546_v42  ;;  %1079 = vmatprep.subr.mxu0 %v667_v18  ;;  %1147 = vmatprep.subr.mxu1 %v667_v18 }
  0xc2   : > { %1080 = vmatpush3.msra.mxu0 %v667_v18  ;;  %1163 = vmatpush3.msra.mxu1 %v667_v18 }
  0xc3   : > { %v1556_v19 = vsub.f32 %v1371_v20, %v308_v48  ;;  %442 = vadd.xlane.f32.xlu1 %v386_v43  ;;  %412 = vadd.xlane.f32.xlu0 %v371_v10  ;;  %v1559_v11 = vsub.f32 %v1374_v21, %v324_v49  ;;  %v665_v21 = vld [vmem:[%s1809_s3 + $0x8] sm:$0xff] }
  0xc4   : > { %v256_v56 = vpop.xlane.xlu0 %255  ;;  %v288_v57 = vpop.xlane.xlu1 %287  ;;  %1081 = vmatprep.subr.mxu0 %v666_v55  ;;  %1148 = vmatprep.subr.mxu1 %v666_v55 }
  0xc5   : > { %v309_v58 = vmul.f32 0.0078125, %v256_v56  ;;  %v372_v20 = vmul.f32 %v1556_v19, %v1556_v19  ;;  %v325_v12 = vmul.f32 0.0078125, %v288_v57  ;;  %v388_v0 = vmul.f32 %v1559_v11, %v1559_v11  ;;  %1082 = vmatpush3.msra.mxu0 %v666_v55  ;;  %1164 = vmatpush3.msra.mxu1 %v666_v55 }
  0xc6   : > { %1083 = vmatprep.subr.mxu0 %v665_v21  ;;  %1149 = vmatprep.subr.mxu1 %v665_v21 }
  0xc7   : > { %v1572_v59 = vsub.f32 %v1379_v22, %v309_v58  ;;  %444 = vadd.xlane.f32.xlu1 %v387_v52  ;;  %414 = vadd.xlane.f32.xlu0 %v372_v20  ;;  %v1575_v13 = vsub.f32 %v1382_v23, %v325_v12  ;;  %v664_v22 = vld [vmem:[%s1809_s3] sm:$0xff] }
  0xc8   : > { %v258_v1 = vpop.xlane.xlu0 %257  ;;  %v290_v2 = vpop.xlane.xlu1 %289  ;;  %1084 = vmatpush3.msra.mxu0 %v665_v21  ;;  %1165 = vmatpush3.msra.mxu1 %v665_v21 }
  0xc9   : > { %v310_v3 = vmul.f32 0.0078125, %v258_v1  ;;  %v373_v4 = vmul.f32 %v1572_v59, %v1572_v59  ;;  %v326_v5 = vmul.f32 0.0078125, %v290_v2  ;;  %v389_v33 = vmul.f32 %v1575_v13, %v1575_v13  ;;  %1085 = vmatprep.subr.mxu0 %v664_v22  ;;  %1150 = vmatprep.subr.mxu1 %v664_v22 }
  0xca   : > { %1086 = vmatpush3.msra.mxu0 %v664_v22  ;;  %1166 = vmatpush3.msra.mxu1 %v664_v22 }
  0xcb   : > { %v1585_v23 = vsub.f32 %v1387_v24, %v310_v3  ;;  %446 = vadd.xlane.f32.xlu1 %v388_v0  ;;  %416 = vadd.xlane.f32.xlu0 %v373_v4  ;;  %v1588_v14 = vsub.f32 %v1390_v25, %v326_v5 }
  0xcc   : > { %v260_v34 = vpop.xlane.xlu0 %259  ;;  %v292_v35 = vpop.xlane.xlu1 %291 }
  0xcd   : > { %v311_v36 = vmul.f32 0.0078125, %v260_v34  ;;  %v374_v37 = vmul.f32 %v1585_v23, %v1585_v23  ;;  %v327_v16 = vmul.f32 0.0078125, %v292_v35  ;;  %v390_v40 = vmul.f32 %v1588_v14, %v1588_v14 }
  0xcf   : > { %v1595_v24 = vsub.f32 %v1395_v26, %v311_v36  ;;  %448 = vadd.xlane.f32.xlu1 %v389_v33  ;;  %418 = vadd.xlane.f32.xlu0 %v374_v37  ;;  %v1598_v25 = vsub.f32 %v1398_v27, %v327_v16 }
  0xd0   : > { %v262_v17 = vpop.xlane.xlu0 %261  ;;  %v294_v43 = vpop.xlane.xlu1 %293 }
  0xd1   : > { %v312_v44 = vmul.f32 0.0078125, %v262_v17  ;;  %v375_v47 = vmul.f32 %v1595_v24, %v1595_v24  ;;  %v328_v48 = vmul.f32 0.0078125, %v294_v43  ;;  %v391_v27 = vmul.f32 %v1598_v25, %v1598_v25 }
  0xd3   : > { %v1605_v10 = vsub.f32 %v1403_v28, %v312_v44  ;;  %450 = vadd.xlane.f32.xlu1 %v390_v40  ;;  %420 = vadd.xlane.f32.xlu0 %v375_v47  ;;  %v1608_v26 = vsub.f32 %v1406_v29, %v328_v48 }
  0xd4   : > { %v264_v49 = vpop.xlane.xlu0 %263  ;;  %v296_v18 = vpop.xlane.xlu1 %295 }
  0xd5   : > { %v313_v52 = vmul.f32 0.0078125, %v264_v49  ;;  %v376_v55 = vmul.f32 %v1605_v10, %v1605_v10  ;;  %v329_v56 = vmul.f32 0.0078125, %v296_v18  ;;  %v392_v29 = vmul.f32 %v1608_v26, %v1608_v26 }
  0xd7   : > { %v1615_v57 = vsub.f32 %v1411_v30, %v313_v52  ;;  %452 = vadd.xlane.f32.xlu1 %v391_v27  ;;  %422 = vadd.xlane.f32.xlu0 %v376_v55  ;;  %v1618_v28 = vsub.f32 %v1414_v31, %v329_v56  ;;  %v1629_v52 = vld [vmem:[%s1807_s1] ss:$0 sm:$0xff] }
  0xd9   : > { %v377_v58 = vmul.f32 %v1615_v57, %v1615_v57  ;;  %v393_v20 = vmul.f32 %v1618_v28, %v1618_v28 }
  0xdb   : > { %454 = vadd.xlane.f32.xlu1 %v392_v29  ;;  %424 = vadd.xlane.f32.xlu0 %v377_v58 }
  0xdf   : > { %456 = vadd.xlane.f32.xlu1 %v393_v20 }
 0x128   : > { %v395_v12 = vpop.xlane.xlu0 %394 }
 0x129   : > { %v458_v30 = vmul.f32 0.0078125, %v395_v12  ;;  %v1635_v12 = vld [vmem:[%s1808_s2] ss:$0 sm:$0xff] }
 0x12b   : > { %v490_v21 = vadd.f32 1e-05, %v458_v30 }
 0x12c   : > { %v427_v0 = vpop.xlane.xlu1 %426  ;;  %v397_v1 = vpop.xlane.xlu0 %396 }
 0x12d   : > { %1175 = vrsqrt.f32 %v490_v21  ;;  %v474_v31 = vmul.f32 0.0078125, %v427_v0  ;;  %v459_v2 = vmul.f32 0.0078125, %v397_v1 }
 0x12f   : > { %v506_v3 = vadd.f32 1e-05, %v474_v31  ;;  %v491_v4 = vadd.f32 1e-05, %v459_v2 }
 0x130   : > { %v429_v5 = vpop.xlane.xlu1 %428  ;;  %v399_v22 = vpop.xlane.xlu0 %398 }
 0x131   : > { %1177 = vrsqrt.f32 %v506_v3  ;;  %v475_v33 = vmul.f32 0.0078125, %v429_v5  ;;  %v460_v34 = vmul.f32 0.0078125, %v399_v22 }
 0x132   : > { %1179 = vrsqrt.f32 %v491_v4 }
 0x133   : > { %v507_v35 = vadd.f32 1e-05, %v475_v33  ;;  %v492_v36 = vadd.f32 1e-05, %v460_v34 }
 0x134   : > { %v431_v37 = vpop.xlane.xlu1 %430  ;;  %v401_v16 = vpop.xlane.xlu0 %400 }
 0x135   : > { %1181 = vrsqrt.f32 %v507_v35  ;;  %v476_v40 = vmul.f32 0.0078125, %v431_v37  ;;  %v461_v17 = vmul.f32 0.0078125, %v401_v16 }
 0x136   : > { %1183 = vrsqrt.f32 %v492_v36 }
 0x137   : > { %v508_v43 = vadd.f32 1e-05, %v476_v40  ;;  %v493_v44 = vadd.f32 1e-05, %v461_v17 }
 0x138   : > { %v433_v47 = vpop.xlane.xlu1 %432  ;;  %v403_v48 = vpop.xlane.xlu0 %402 }
 0x139   : > { %1185 = vrsqrt.f32 %v508_v43  ;;  %v477_v27 = vmul.f32 0.0078125, %v433_v47  ;;  %v462_v49 = vmul.f32 0.0078125, %v403_v48 }
 0x13a   : > { %v1176_v18 = vpop.eup %1175  ;;  %1187 = vrsqrt.f32 %v493_v44 }
 0x13b   : > { %v509_v55 = vadd.f32 1e-05, %v477_v27  ;;  %v494_v56 = vadd.f32 1e-05, %v462_v49  ;;  %v554_v29 = vmul.f32 %v1176_v18, %v1425_v38 }
 0x13c   : > { %v435_v58 = vpop.xlane.xlu1 %434  ;;  %v405_v20 = vpop.xlane.xlu0 %404 }
 0x13d   : > { %1189 = vrsqrt.f32 %v509_v55  ;;  %v478_v30 = vmul.f32 0.0078125, %v435_v58  ;;  %v463_v21 = vmul.f32 0.0078125, %v405_v20  ;;  %v593_v0 = vmul.f32 %v1629_v52, %v554_v29 }
 0x13e   : > { %v1178_v1 = vpop.eup %1177  ;;  %1191 = vrsqrt.f32 %v494_v56 }
 0x13f   : > { %v1180_v31 = vpop.eup %1179  ;;  %v510_v2 = vadd.f32 1e-05, %v478_v30  ;;  %v495_v3 = vadd.f32 1e-05, %v463_v21  ;;  %v632_v4 = vadd.f32 %v1635_v12, %v593_v0  ;;  %v570_v38 = vmul.f32 %v1178_v1, %v1433_v45 }
 0x140   : > { %v437_v5 = vpop.xlane.xlu1 %436  ;;  %v407_v22 = vpop.xlane.xlu0 %406  ;;  %v555_v33 = vmul.f32 %v1180_v31, %v1428_v39 }
 0x141   : > { %1193 = vrsqrt.f32 %v510_v2  ;;  %v479_v34 = vmul.f32 0.0078125, %v437_v5  ;;  %v464_v35 = vmul.f32 0.0078125, %v407_v22  ;;  %1087 = vmatprep.mubr.f32.mxu0 %v632_v4  ;;  %v609_v36 = vmul.f32 %v1629_v52, %v570_v38 }
 0x142   : > { %v1182_v37 = vpop.eup %1181  ;;  %1195 = vrsqrt.f32 %v495_v3  ;;  %v594_v16 = vmul.f32 %v1629_v52, %v555_v33 }
 0x143   : > { %v1184_v40 = vpop.eup %1183  ;;  %v511_v17 = vadd.f32 1e-05, %v479_v34  ;;  %v496_v43 = vadd.f32 1e-05, %v464_v35  ;;  %v648_v44 = vadd.f32 %v1635_v12, %v609_v36  ;;  %v571_v45 = vmul.f32 %v1182_v37, %v1436_v46 }
 0x144   : > { %v439_v47 = vpop.xlane.xlu1 %438  ;;  %v409_v48 = vpop.xlane.xlu0 %408  ;;  %v633_v39 = vadd.f32 %v1635_v12, %v594_v16  ;;  %v556_v27 = vmul.f32 %v1184_v40, %v1443_v53 }
 0x145   : > { %1197 = vrsqrt.f32 %v511_v17  ;;  %v480_v49 = vmul.f32 0.0078125, %v439_v47  ;;  %v465_v18 = vmul.f32 0.0078125, %v409_v48  ;;  %1111 = vmatprep.mubr.f32.mxu1 %v648_v44  ;;  %v610_v55 = vmul.f32 %v1629_v52, %v571_v45 }
 0x146   : > { %v1186_v56 = vpop.eup %1185  ;;  %1199 = vrsqrt.f32 %v496_v43  ;;  %1088 = vmatmul.mubr.f32.vlgmr.msra.gmra.mxu0 %v633_v39  ;;  %v595_v29 = vmul.f32 %v1629_v52, %v556_v27 }
 0x147   : > { %v1188_v58 = vpop.eup %1187  ;;  %v512_v20 = vadd.f32 1e-05, %v480_v49  ;;  %v497_v46 = vadd.f32 1e-05, %v465_v18  ;;  %v649_v30 = vadd.f32 %v1635_v12, %v610_v55  ;;  %v572_v21 = vmul.f32 %v1186_v56, %v1446_v54 }
 0x148   : > { %v441_v0 = vpop.xlane.xlu1 %440  ;;  %v411_v53 = vpop.xlane.xlu0 %410  ;;  %v634_v1 = vadd.f32 %v1635_v12, %v595_v29  ;;  %v557_v31 = vmul.f32 %v1188_v58, %v1453_v61 }
 0x149   : > { %1201 = vrsqrt.f32 %v512_v20  ;;  %v481_v2 = vmul.f32 0.0078125, %v441_v0  ;;  %v466_v3 = vmul.f32 0.0078125, %v411_v53  ;;  %1112 = vmatmul.mubr.f32.vlgmr.msra.gmra.mxu1 %v649_v30  ;;  %v611_v4 = vmul.f32 %v1629_v52, %v572_v21 }
 0x14a   : > { %v1190_v38 = vpop.eup %1189  ;;  %1203 = vrsqrt.f32 %v497_v46  ;;  %1090 = vmatprep.mubr.f32.mxu0 %v634_v1  ;;  %v596_v5 = vmul.f32 %v1629_v52, %v557_v31 }
 0x14b   : > { %v1192_v22 = vpop.eup %1191  ;;  %v513_v33 = vadd.f32 1e-05, %v481_v2  ;;  %v498_v54 = vadd.f32 1e-05, %v466_v3  ;;  %v650_v34 = vadd.f32 %v1635_v12, %v611_v4  ;;  %v573_v35 = vmul.f32 %v1190_v38, %v1456_v62 }
 0x14c   : > { %v443_v36 = vpop.xlane.xlu1 %442  ;;  %v413_v61 = vpop.xlane.xlu0 %412  ;;  %v635_v37 = vadd.f32 %v1635_v12, %v596_v5  ;;  %v558_v16 = vmul.f32 %v1192_v22, %v1469_v7 }
 0x14d   : > { %1205 = vrsqrt.f32 %v513_v33  ;;  %v482_v40 = vmul.f32 0.0078125, %v443_v36  ;;  %v467_v17 = vmul.f32 0.0078125, %v413_v61  ;;  %1114 = vmatprep.mubr.f32.mxu1 %v650_v34  ;;  %v612_v43 = vmul.f32 %v1629_v52, %v573_v35 }
 0x14e   : > { %v1194_v44 = vpop.eup %1193  ;;  %1207 = vrsqrt.f32 %v498_v54  ;;  %1091 = vmatmul.mubr.f32.gmra.mxu0 %v635_v37  ;;  %v597_v45 = vmul.f32 %v1629_v52, %v558_v16 }
 0x14f   : > { %v1196_v47 = vpop.eup %1195  ;;  %v514_v48 = vadd.f32 1e-05, %v482_v40  ;;  %v499_v62 = vadd.f32 1e-05, %v467_v17  ;;  %v651_v39 = vadd.f32 %v1635_v12, %v612_v43  ;;  %v574_v27 = vmul.f32 %v1194_v44, %v1472_v32 }
 0x150   : > { %v445_v49 = vpop.xlane.xlu1 %444  ;;  %v415_v7 = vpop.xlane.xlu0 %414  ;;  %v636_v18 = vadd.f32 %v1635_v12, %v597_v45  ;;  %v559_v55 = vmul.f32 %v1196_v47, %v1482_v9 }
 0x151   : > { %1209 = vrsqrt.f32 %v514_v48  ;;  %v483_v56 = vmul.f32 0.0078125, %v445_v49  ;;  %v468_v29 = vmul.f32 0.0078125, %v415_v7  ;;  %1115 = vmatmul.mubr.f32.gmra.mxu1 %v651_v39  ;;  %v613_v58 = vmul.f32 %v1629_v52, %v574_v27 }
 0x152   : > { %v1198_v20 = vpop.eup %1197  ;;  %1211 = vrsqrt.f32 %v499_v62  ;;  %1093 = vmatprep.mubr.f32.mxu0 %v636_v18  ;;  %v598_v46 = vmul.f32 %v1629_v52, %v559_v55 }
 0x153   : > { %v1200_v30 = vpop.eup %1199  ;;  %v515_v21 = vadd.f32 1e-05, %v483_v56  ;;  %v500_v32 = vadd.f32 1e-05, %v468_v29  ;;  %v652_v0 = vadd.f32 %v1635_v12, %v613_v58  ;;  %v575_v53 = vmul.f32 %v1198_v20, %v1485_v41 }
 0x154   : > { %v447_v1 = vpop.xlane.xlu1 %446  ;;  %v417_v9 = vpop.xlane.xlu0 %416  ;;  %v637_v31 = vadd.f32 %v1635_v12, %v598_v46  ;;  %v560_v2 = vmul.f32 %v1200_v30, %v1498_v50 }
 0x155   : > { %1213 = vrsqrt.f32 %v515_v21  ;;  %v484_v3 = vmul.f32 0.0078125, %v447_v1  ;;  %v469_v4 = vmul.f32 0.0078125, %v417_v9  ;;  %1117 = vmatprep.mubr.f32.mxu1 %v652_v0  ;;  %v614_v38 = vmul.f32 %v1629_v52, %v575_v53 }
 0x156   : > { %v1202_v5 = vpop.eup %1201  ;;  %1215 = vrsqrt.f32 %v500_v32  ;;  %1094 = vmatmul.mubr.f32.gmra.mxu0 %v637_v31  ;;  %v599_v22 = vmul.f32 %v1629_v52, %v560_v2 }
 0x157   : > { %v1204_v33 = vpop.eup %1203  ;;  %v516_v54 = vadd.f32 1e-05, %v484_v3  ;;  %v501_v41 = vadd.f32 1e-05, %v469_v4  ;;  %v653_v34 = vadd.f32 %v1635_v12, %v614_v38  ;;  %v576_v35 = vmul.f32 %v1202_v5, %v1501_v51 }
 0x158   : > { %v449_v36 = vpop.xlane.xlu1 %448  ;;  %v419_v50 = vpop.xlane.xlu0 %418  ;;  %v638_v61 = vadd.f32 %v1635_v12, %v599_v22  ;;  %v561_v37 = vmul.f32 %v1204_v33, %v1514_v60 }
 0x159   : > { %1217 = vrsqrt.f32 %v516_v54  ;;  %v485_v16 = vmul.f32 0.0078125, %v449_v36  ;;  %v470_v40 = vmul.f32 0.0078125, %v419_v50  ;;  %1118 = vmatmul.mubr.f32.gmra.mxu1 %v653_v34  ;;  %v615_v17 = vmul.f32 %v1629_v52, %v576_v35 }
 0x15a   : > { %v1206_v43 = vpop.eup %1205  ;;  %1219 = vrsqrt.f32 %v501_v41  ;;  %1096 = vmatprep.mubr.f32.mxu0 %v638_v61  ;;  %v600_v44 = vmul.f32 %v1629_v52, %v561_v37 }
 0x15b   : > { %v1208_v45 = vpop.eup %1207  ;;  %v517_v47 = vadd.f32 1e-05, %v485_v16  ;;  %v502_v51 = vadd.f32 1e-05, %v470_v40  ;;  %v654_v48 = vadd.f32 %v1635_v12, %v615_v17  ;;  %v577_v62 = vmul.f32 %v1206_v43, %v1517_v63 }
 0x15c   : > { %v451_v39 = vpop.xlane.xlu1 %450  ;;  %v421_v60 = vpop.xlane.xlu0 %420  ;;  %v639_v27 = vadd.f32 %v1635_v12, %v600_v44  ;;  %v562_v49 = vmul.f32 %v1208_v45, %v1527_v15 }
 0x15d   : > { %1221 = vrsqrt.f32 %v517_v47  ;;  %v486_v7 = vmul.f32 0.0078125, %v451_v39  ;;  %v471_v18 = vmul.f32 0.0078125, %v421_v60  ;;  %1120 = vmatprep.mubr.f32.mxu1 %v654_v48  ;;  %v616_v55 = vmul.f32 %v1629_v52, %v577_v62 }
 0x15e   : > { %v1210_v56 = vpop.eup %1209  ;;  %1223 = vrsqrt.f32 %v502_v51  ;;  %1097 = vmatmul.mubr.f32.gmra.mxu0 %v639_v27  ;;  %v601_v29 = vmul.f32 %v1629_v52, %v562_v49 }
 0x15f   : > { %v1212_v58 = vpop.eup %1211  ;;  %v518_v20 = vadd.f32 1e-05, %v486_v7  ;;  %v503_v63 = vadd.f32 1e-05, %v471_v18  ;;  %v655_v46 = vadd.f32 %v1635_v12, %v616_v55  ;;  %v578_v30 = vmul.f32 %v1210_v56, %v1530_v6 }
 0x160   : > { %v453_v21 = vpop.xlane.xlu1 %452  ;;  %v423_v15 = vpop.xlane.xlu0 %422  ;;  %v640_v32 = vadd.f32 %v1635_v12, %v601_v29  ;;  %v563_v0 = vmul.f32 %v1212_v58, %v1543_v8 }
 0x161   : > { %1225 = vrsqrt.f32 %v518_v20  ;;  %v487_v53 = vmul.f32 0.0078125, %v453_v21  ;;  %v472_v1 = vmul.f32 0.0078125, %v423_v15  ;;  %1121 = vmatmul.mubr.f32.gmra.mxu1 %v655_v46  ;;  %v617_v9 = vmul.f32 %v1629_v52, %v578_v30 }
 0x162   : > { %v1214_v31 = vpop.eup %1213  ;;  %1227 = vrsqrt.f32 %v503_v63  ;;  %1099 = vmatprep.mubr.f32.mxu0 %v640_v32  ;;  %v602_v2 = vmul.f32 %v1629_v52, %v563_v0 }
 0x163   : > { %v1216_v3 = vpop.eup %1215  ;;  %v519_v4 = vadd.f32 1e-05, %v487_v53  ;;  %v504_v6 = vadd.f32 1e-05, %v472_v1  ;;  %v656_v38 = vadd.f32 %v1635_v12, %v617_v9  ;;  %v579_v5 = vmul.f32 %v1214_v31, %v1546_v42 }
 0x164   : > { %v455_v22 = vpop.xlane.xlu1 %454  ;;  %v425_v8 = vpop.xlane.xlu0 %424  ;;  %v641_v33 = vadd.f32 %v1635_v12, %v602_v2  ;;  %v564_v54 = vmul.f32 %v1216_v3, %v1556_v19 }
 0x165   : > { %1229 = vrsqrt.f32 %v519_v4  ;;  %v488_v41 = vmul.f32 0.0078125, %v455_v22  ;;  %v473_v34 = vmul.f32 0.0078125, %v425_v8  ;;  %1123 = vmatprep.mubr.f32.mxu1 %v656_v38  ;;  %v618_v35 = vmul.f32 %v1629_v52, %v579_v5 }
 0x166   : > { %v1218_v36 = vpop.eup %1217  ;;  %1231 = vrsqrt.f32 %v504_v6  ;;  %1100 = vmatmul.mubr.f32.gmra.mxu0 %v641_v33  ;;  %v603_v50 = vmul.f32 %v1629_v52, %v564_v54 }
 0x167   : > { %v1220_v61 = vpop.eup %1219  ;;  %v520_v37 = vadd.f32 1e-05, %v488_v41  ;;  %v505_v42 = vadd.f32 1e-05, %v473_v34  ;;  %v657_v16 = vadd.f32 %v1635_v12, %v618_v35  ;;  %v580_v40 = vmul.f32 %v1218_v36, %v1559_v11 }
 0x168   : > { %v457_v17 = vpop.xlane.xlu1 %456  ;;  %v642_v19 = vadd.f32 %v1635_v12, %v603_v50  ;;  %v565_v43 = vmul.f32 %v1220_v61, %v1572_v59 }
 0x169   : > { %1233 = vrsqrt.f32 %v520_v37  ;;  %v489_v44 = vmul.f32 0.0078125, %v457_v17  ;;  %1124 = vmatmul.mubr.f32.gmra.mxu1 %v657_v16  ;;  %v619_v45 = vmul.f32 %v1629_v52, %v580_v40 }
 0x16a   : > { %v1222_v47 = vpop.eup %1221  ;;  %1235 = vrsqrt.f32 %v505_v42  ;;  %1102 = vmatprep.mubr.f32.mxu0 %v642_v19  ;;  %v604_v51 = vmul.f32 %v1629_v52, %v565_v43 }
 0x16b   : > { %v1224_v48 = vpop.eup %1223  ;;  %v521_v62 = vadd.f32 1e-05, %v489_v44  ;;  %v658_v39 = vadd.f32 %v1635_v12, %v619_v45  ;;  %v581_v11 = vmul.f32 %v1222_v47, %v1575_v13 }
 0x16c   : > { %v643_v60 = vadd.f32 %v1635_v12, %v604_v51  ;;  %v566_v59 = vmul.f32 %v1224_v48, %v1585_v23 }
 0x16d   : > { %1237 = vrsqrt.f32 %v521_v62  ;;  %1126 = vmatprep.mubr.f32.mxu1 %v658_v39  ;;  %v620_v27 = vmul.f32 %v1629_v52, %v581_v11 }
 0x16e   : > { %v1226_v49 = vpop.eup %1225  ;;  %1103 = vmatmul.mubr.f32.gmra.mxu0 %v643_v60  ;;  %v605_v7 = vmul.f32 %v1629_v52, %v566_v59 }
 0x16f   : > { %v1228_v18 = vpop.eup %1227  ;;  %v659_v55 = vadd.f32 %v1635_v12, %v620_v27  ;;  %v582_v56 = vmul.f32 %v1226_v49, %v1588_v14 }
 0x170   : > { %v644_v29 = vadd.f32 %v1635_v12, %v605_v7  ;;  %v567_v13 = vmul.f32 %v1228_v18, %v1595_v24 }
 0x171   : > { %1127 = vmatmul.mubr.f32.gmra.mxu1 %v659_v55  ;;  %v621_v23 = vmul.f32 %v1629_v52, %v582_v56 }
 0x172   : > { %v1230_v58 = vpop.eup %1229  ;;  %1105 = vmatprep.mubr.f32.mxu0 %v644_v29  ;;  %v606_v20 = vmul.f32 %v1629_v52, %v567_v13 }
 0x173   : > { %v1232_v63 = vpop.eup %1231  ;;  %v660_v46 = vadd.f32 %v1635_v12, %v621_v23  ;;  %v583_v30 = vmul.f32 %v1230_v58, %v1598_v25 }
 0x174   : > { %v645_v21 = vadd.f32 %v1635_v12, %v606_v20  ;;  %v568_v14 = vmul.f32 %v1232_v63, %v1605_v10 }
 0x175   : > { %1129 = vmatprep.mubr.f32.mxu1 %v660_v46  ;;  %v622_v15 = vmul.f32 %v1629_v52, %v583_v30 }
 0x176   : > { %v1234_v24 = vpop.eup %1233  ;;  %1106 = vmatmul.mubr.f32.gmra.mxu0 %v645_v21  ;;  %v607_v32 = vmul.f32 %v1629_v52, %v568_v14 }
 0x177   : > { %v1236_v0 = vpop.eup %1235  ;;  %v661_v53 = vadd.f32 %v1635_v12, %v622_v15  ;;  %v584_v1 = vmul.f32 %v1234_v24, %v1608_v26 }
 0x178   : > { %v646_v9 = vadd.f32 %v1635_v12, %v607_v32  ;;  %v569_v25 = vmul.f32 %v1236_v0, %v1615_v57 }
 0x179   : > { %1130 = vmatmul.mubr.f32.gmra.mxu1 %v661_v53  ;;  %v623_v10 = vmul.f32 %v1629_v52, %v584_v1 }
 0x17a   : > { %v1238_v31 = vpop.eup %1237  ;;  %1108 = vmatprep.mubr.f32.mxu0 %v646_v9  ;;  %v608_v2 = vmul.f32 %v1629_v52, %v569_v25 }
 0x17b   : > { %v662_v3 = vadd.f32 %v1635_v12, %v623_v10  ;;  %v585_v4 = vmul.f32 %v1238_v31, %v1618_v28 }
 0x17c   : > { %v647_v6 = vadd.f32 %v1635_v12, %v608_v2 }
 0x17d   : > { %1132 = vmatprep.mubr.f32.mxu1 %v662_v3  ;;  %v624_v26 = vmul.f32 %v1629_v52, %v585_v4 }
 0x17e   : > { %1109 = vmatmul.mubr.f32.gmra.mxu0 %v647_v6 }
 0x17f   : > { %v663_v38 = vadd.f32 %v1635_v12, %v624_v26 }
 0x181   : > { %1133 = vmatmul.mubr.f32.gmra.mxu1 %v663_v38 }
 0x206   : > { %v1089_v57 = vpop.f32.mrf.mxu0 }
 0x207   : > { %907 = vst.msk [vmem:[%s1737_s11 + $0x8] sm:$0xff] %vm905_vm0, %v1089_v57 }
 0x208   : > { %v746_v28 = vpop.f32.mrf.mxu0 }
 0x209   : > { %906 = vst.msk [vmem:[%s1737_s11] sm:$0xff] %vm905_vm0, %v746_v28  ;;  %v1113_v52 = vpop.f32.mrf.mxu1 }
 0x20a   : > { %923 = vst.msk [vmem:[%s1737_s11 + $0x88] sm:$0xff] %vm905_vm0, %v1113_v52 }
 0x20b   : > { %v826_v12 = vpop.f32.mrf.mxu1 }
 0x20c   : > { %922 = vst.msk [vmem:[%s1737_s11 + $0x80] sm:$0xff] %vm905_vm0, %v826_v12 }
 0x20e   : > { %v1092_v5 = vpop.f32.mrf.mxu0 }
 0x20f   : > { %909 = vst.msk [vmem:[%s1737_s11 + $0x18] sm:$0xff] %vm905_vm0, %v1092_v5 }
 0x210   : > { %v756_v22 = vpop.f32.mrf.mxu0 }
 0x211   : > { %908 = vst.msk [vmem:[%s1737_s11 + $0x10] sm:$0xff] %vm905_vm0, %v756_v22  ;;  %v1116_v8 = vpop.f32.mrf.mxu1 }
 0x212   : > { %925 = vst.msk [vmem:[%s1737_s11 + $0x98] sm:$0xff] %vm905_vm0, %v1116_v8 }
 0x213   : > { %v836_v33 = vpop.f32.mrf.mxu1 }
 0x214   : > { %924 = vst.msk [vmem:[%s1737_s11 + $0x90] sm:$0xff] %vm905_vm0, %v836_v33 }
 0x216   : > { %v1095_v54 = vpop.f32.mrf.mxu0 }
 0x217   : > { %911 = vst.msk [vmem:[%s1737_s11 + $0x28] sm:$0xff] %vm905_vm0, %v1095_v54 }
 0x218   : > { %v766_v41 = vpop.f32.mrf.mxu0 }
 0x219   : > { %910 = vst.msk [vmem:[%s1737_s11 + $0x20] sm:$0xff] %vm905_vm0, %v766_v41  ;;  %v1119_v34 = vpop.f32.mrf.mxu1 }
 0x21a   : > { %927 = vst.msk [vmem:[%s1737_s11 + $0xa8] sm:$0xff] %vm905_vm0, %v1119_v34 }
 0x21b   : > { %v846_v35 = vpop.f32.mrf.mxu1 }
 0x21c   : > { %926 = vst.msk [vmem:[%s1737_s11 + $0xa0] sm:$0xff] %vm905_vm0, %v846_v35 }
 0x21e   : > { %v1098_v36 = vpop.f32.mrf.mxu0 }
 0x21f   : > { %913 = vst.msk [vmem:[%s1737_s11 + $0x38] sm:$0xff] %vm905_vm0, %v1098_v36 }
 0x220   : > { %v776_v50 = vpop.f32.mrf.mxu0 }
 0x221   : > { %912 = vst.msk [vmem:[%s1737_s11 + $0x30] sm:$0xff] %vm905_vm0, %v776_v50  ;;  %v1122_v61 = vpop.f32.mrf.mxu1 }
 0x222   : > { %929 = vst.msk [vmem:[%s1737_s11 + $0xb8] sm:$0xff] %vm905_vm0, %v1122_v61 }
 0x223   : > { %v856_v37 = vpop.f32.mrf.mxu1 }
 0x224   : > { %928 = vst.msk [vmem:[%s1737_s11 + $0xb0] sm:$0xff] %vm905_vm0, %v856_v37 }
 0x226   : > { %v1101_v42 = vpop.f32.mrf.mxu0 }
 0x227   : > { %915 = vst.msk [vmem:[%s1737_s11 + $0x48] sm:$0xff] %vm905_vm0, %v1101_v42 }
 0x228   : > { %v786_v16 = vpop.f32.mrf.mxu0 }
 0x229   : > { %914 = vst.msk [vmem:[%s1737_s11 + $0x40] sm:$0xff] %vm905_vm0, %v786_v16  ;;  %v1125_v40 = vpop.f32.mrf.mxu1 }
 0x22a   : > { %931 = vst.msk [vmem:[%s1737_s11 + $0xc8] sm:$0xff] %vm905_vm0, %v1125_v40 }
 0x22b   : > { %v866_v17 = vpop.f32.mrf.mxu1 }
 0x22c   : > { %930 = vst.msk [vmem:[%s1737_s11 + $0xc0] sm:$0xff] %vm905_vm0, %v866_v17 }
 0x22e   : > { %v1104_v19 = vpop.f32.mrf.mxu0 }
 0x22f   : > { %917 = vst.msk [vmem:[%s1737_s11 + $0x58] sm:$0xff] %vm905_vm0, %v1104_v19 }
 0x230   : > { %v796_v43 = vpop.f32.mrf.mxu0 }
 0x231   : > { %916 = vst.msk [vmem:[%s1737_s11 + $0x50] sm:$0xff] %vm905_vm0, %v796_v43  ;;  %v1128_v44 = vpop.f32.mrf.mxu1 }
 0x232   : > { %933 = vst.msk [vmem:[%s1737_s11 + $0xd8] sm:$0xff] %vm905_vm0, %v1128_v44 }
 0x233   : > { %v876_v45 = vpop.f32.mrf.mxu1 }
 0x234   : > { %932 = vst.msk [vmem:[%s1737_s11 + $0xd0] sm:$0xff] %vm905_vm0, %v876_v45 }
 0x236   : > { %v1107_v47 = vpop.f32.mrf.mxu0 }
 0x237   : > { %919 = vst.msk [vmem:[%s1737_s11 + $0x68] sm:$0xff] %vm905_vm0, %v1107_v47 }
 0x238   : > { %v806_v51 = vpop.f32.mrf.mxu0 }
 0x239   : > { %918 = vst.msk [vmem:[%s1737_s11 + $0x60] sm:$0xff] %vm905_vm0, %v806_v51  ;;  %v1131_v48 = vpop.f32.mrf.mxu1 }
 0x23a   : > { %935 = vst.msk [vmem:[%s1737_s11 + $0xe8] sm:$0xff] %vm905_vm0, %v1131_v48 }
 0x23b   : > { %v886_v62 = vpop.f32.mrf.mxu1 }
 0x23c   : > { %934 = vst.msk [vmem:[%s1737_s11 + $0xe0] sm:$0xff] %vm905_vm0, %v886_v62 }
 0x23e   : > { %v1110_v39 = vpop.f32.mrf.mxu0 }
 0x23f   : > { %921 = vst.msk [vmem:[%s1737_s11 + $0x78] sm:$0xff] %vm905_vm0, %v1110_v39 }
 0x240   : > { %v816_v11 = vpop.f32.mrf.mxu0 }
 0x241   : > { %920 = vst.msk [vmem:[%s1737_s11 + $0x70] sm:$0xff] %vm905_vm0, %v816_v11  ;;  %v1134_v60 = vpop.f32.mrf.mxu1 }
 0x242   : > { %937 = vst.msk [vmem:[%s1737_s11 + $0xf8] sm:$0xff] %vm905_vm0, %v1134_v60 }
 0x243   : > { %v896_v59 = vpop.f32.mrf.mxu1 }
 0x244   : > { %936 = vst.msk [vmem:[%s1737_s11 + $0xf0] sm:$0xff] %vm905_vm0, %v896_v59 }
 0x245 PF: > { %s14_s15 = sadd.s32 1, %s1245_s15  }
 0x246   : > { %p11_p4 = scmp.ge.s32.totalorder %s14_s15, 4  }
 0x248   :  { %13 = sbr.rel (!%p11_p4) target bundleno = 1 (0x1), region = 66 }

</bundles_post_ra>
